<compile_context>
chip_gen: v6e
topology: v6e:2x2x1
jax: 0.10.0
libtpu: 0.0.40
codegen_flags: <defaults>
</compile_context>

<pallas_src>
import math

import jax
import jax.numpy as jnp
from jax.experimental import pallas as pl
from jax.experimental.pallas import tpu as pltpu


def _numerical_tokenizer_kernel(x_ref, w_ref, b_ref, out_ref):
    # x_ref  : [tb, n_features]           f32   (batch tile)
    # w_ref  : [n_features, d_token]      f32   (VMEM-resident across the grid)
    # b_ref  : [n_features, d_token]      f32   (VMEM-resident across the grid)
    # out_ref: [tb, n_features, d_token]  f32
    x = x_ref[...]
    w = w_ref[...]
    b = b_ref[...]
    # weight[None] * x[..., None] + bias[None]  — single full-tile store.
    out_ref[...] = x[:, :, None] * w[None, :, :] + b[None, :, :]


def numerical_feature_tokenizer(x, weight, bias=None, *, block_b=None):
    """Pallas-backed NumericalFeatureTokenizer forward.

    Args:
      x:      [B, n_features] float32
      weight: [n_features, d_token] float32
      bias:   optional [n_features, d_token] float32
    Returns:
      [B, n_features, d_token] float32
    """
    B, n_features = x.shape
    nf_w, d = weight.shape
    assert nf_w == n_features, "weight rows must match n_features"
    if bias is None:
        bias = jnp.zeros((n_features, d), dtype=weight.dtype)

    # Batch tile: big enough to hit the HBM roofline, sublane-aligned when partial.
    if block_b is None:
        block_b = B if B <= 512 else 512
    if block_b != B:
        block_b = max(8, (block_b // 8) * 8)
    grid = (pl.cdiv(B, block_b),)

    itemsize = jnp.dtype(jnp.float32).itemsize
    bytes_accessed = (B * n_features            # x
                      + 2 * n_features * d      # weight + bias
                      + B * n_features * d      # output
                      ) * itemsize
    cost = pl.CostEstimate(
        flops=2 * B * n_features * d, transcendentals=0, bytes_accessed=bytes_accessed
    )

    # VMEM budget: double-buffered x/out tiles + resident weight & bias, with headroom.
    tile_bytes = (2 * block_b * n_features
                  + 2 * block_b * n_features * d
                  + 2 * n_features * d) * itemsize
    vmem_limit = int(min(max(2 * tile_bytes, 4 << 20), 32 << 20))  # safe on v5e/v6e/v7x

    return pl.pallas_call(
        _numerical_tokenizer_kernel,
        out_shape=jax.ShapeDtypeStruct((B, n_features, d), jnp.float32),
        grid=grid,
        in_specs=[
            pl.BlockSpec((block_b, n_features), lambda i: (i, 0)),  # x: tiled over B
            pl.BlockSpec((n_features, d), lambda i: (0, 0)),        # weight: resident
            pl.BlockSpec((n_features, d), lambda i: (0, 0)),        # bias: resident
        ],
        out_specs=pl.BlockSpec((block_b, n_features, d), lambda i: (i, 0, 0)),
        compiler_params=pltpu.CompilerParams(
            dimension_semantics=("parallel",),   # shards batch tiles across v7x's 2 TCs
            vmem_limit_bytes=vmem_limit,
        ),
        cost_estimate=cost,
    )(x, weight, bias)


def make_params(key, n_features, d_token, bias=True):
    """Deterministic init matching _TokenInitialization.UNIFORM."""
    bound = 1.0 / math.sqrt(d_token)
    k1, k2 = jax.random.split(key, 2)
    params = {
        "weight": jax.random.uniform(k1, (n_features, d_token), jnp.float32, -bound, bound),
        "bias": jax.random.uniform(k2, (n_features, d_token), jnp.float32, -bound, bound)
        if bias else None,
    }
    return params


def _reference(x, weight, bias):
    out = weight[None] * x[..., None]
    if bias is not None:
        out = out + bias[None]
    return out


if __name__ == "__main__":
    B = 2
    n_features = 3
    d_token = 32

    key = jax.random.PRNGKey(0)
    kp, kx = jax.random.split(key, 2)
    params = make_params(kp, n_features, d_token, bias=True)
    x = jax.random.normal(kx, (B, n_features), dtype=jnp.float32)

    # With bias
    out = numerical_feature_tokenizer(x, params["weight"], params["bias"])
    out = jax.block_until_ready(out)
    ref = _reference(x, params["weight"], params["bias"])
    assert out.shape == (B, n_features, d_token)
    assert jnp.allclose(out, ref, atol=1e-6, rtol=1e-6)

    # Without bias (bias=None branch of the module)
    out_nb = jax.block_until_ready(numerical_feature_tokenizer(x, params["weight"], None))
    ref_nb = _reference(x, params["weight"], None)
    assert jnp.allclose(out_nb, ref_nb, atol=1e-6, rtol=1e-6)

    print("KERNEL_OK")
</pallas_src>

<mosaic_0001>
module attributes {stable_mosaic.version = 11 : i64} {
  func.func @_numerical_tokenizer_kernel(%arg0: i32, %arg1: memref<2x3xf32, #tpu.memory_space<vmem>>, %arg2: memref<3x32xf32, #tpu.memory_space<vmem>>, %arg3: memref<3x32xf32, #tpu.memory_space<vmem>>, %arg4: memref<2x3x32xf32, #tpu.memory_space<vmem>>) attributes {dimension_semantics = [#tpu.dimension_semantics<parallel>], iteration_bounds = array<i64: 1>, scalar_prefetch = 0 : i64, scratch_operands = 0 : i64, tpu.core_type = #tpu.core_type<tc>, window_params = [{transform_indices = @transform_0, window_bounds = array<i64: 2, 3>}, {pipeline_mode = #tpu.pipeline_mode<synchronous>, transform_indices = @transform_1, window_bounds = array<i64: 3, 32>}, {pipeline_mode = #tpu.pipeline_mode<synchronous>, transform_indices = @transform_2, window_bounds = array<i64: 3, 32>}, {transform_indices = @transform_3, window_bounds = array<i64: 2, 3, 32>}]} {
    %c0 = arith.constant 0 : index
    %c0_0 = arith.constant 0 : index
    %0 = vector.load %arg1[%c0, %c0_0] : memref<2x3xf32, #tpu.memory_space<vmem>>, vector<2x3xf32>
    %c0_1 = arith.constant 0 : index
    %c0_2 = arith.constant 0 : index
    %1 = vector.load %arg2[%c0_1, %c0_2] : memref<3x32xf32, #tpu.memory_space<vmem>>, vector<3x32xf32>
    %c0_3 = arith.constant 0 : index
    %c0_4 = arith.constant 0 : index
    %2 = vector.load %arg3[%c0_3, %c0_4] : memref<3x32xf32, #tpu.memory_space<vmem>>, vector<3x32xf32>
    %3 = vector.shape_cast %0 : vector<2x3xf32> to vector<2x3x1xf32>
    %4 = vector.shape_cast %1 : vector<3x32xf32> to vector<1x3x32xf32>
    %5 = vector.broadcast %3 : vector<2x3x1xf32> to vector<2x3x32xf32>
    %6 = vector.broadcast %4 : vector<1x3x32xf32> to vector<2x3x32xf32>
    %7 = arith.mulf %5, %6 : vector<2x3x32xf32>
    %8 = vector.shape_cast %2 : vector<3x32xf32> to vector<1x3x32xf32>
    %9 = vector.broadcast %8 : vector<1x3x32xf32> to vector<2x3x32xf32>
    %10 = arith.addf %7, %9 : vector<2x3x32xf32>
    %c0_5 = arith.constant 0 : index
    %c0_6 = arith.constant 0 : index
    %c0_7 = arith.constant 0 : index
    %11 = vector.load %arg4[%c0_5, %c0_6, %c0_7] : memref<2x3x32xf32, #tpu.memory_space<vmem>>, vector<2x3x32xf32>
    tpu.vector_store %arg4[%c0_5, %c0_6, %c0_7], %10 {strides = array<i32>} : memref<2x3x32xf32, #tpu.memory_space<vmem>>, vector<2x3x32xf32>,
    return
  }
  func.func @transform_0(%arg0: i32) -> (i32, i32) {
    %c0_i32 = arith.constant 0 : i32
    %c0_i32_0 = arith.constant 0 : i32
    return %arg0, %c0_i32 : i32, i32
  }
  func.func @transform_1(%arg0: i32) -> (i32, i32) {
    %c0_i32 = arith.constant 0 : i32
    %c0_i32_0 = arith.constant 0 : i32
    %c0_i32_1 = arith.constant 0 : i32
    return %c0_i32, %c0_i32_0 : i32, i32
  }
  func.func @transform_2(%arg0: i32) -> (i32, i32) {
    %c0_i32 = arith.constant 0 : i32
    %c0_i32_0 = arith.constant 0 : i32
    %c0_i32_1 = arith.constant 0 : i32
    return %c0_i32, %c0_i32_0 : i32, i32
  }
  func.func @transform_3(%arg0: i32) -> (i32, i32, i32) {
    %c0_i32 = arith.constant 0 : i32
    %c0_i32_0 = arith.constant 0 : i32
    %c0_i32_1 = arith.constant 0 : i32
    return %arg0, %c0_i32, %c0_i32_0 : i32, i32, i32
  }
}

</mosaic_0001>

<bundles_post_ra>
// kernel: tpu_custom_call.1
= control target key start
LH: loop header
LB: loop body
LE: loop exit
PB: predicated region body
PF: predicated region fallthrough
CT: control target
= control target key end

     0   :  { %8 = vsyncpa [#allocation3], 0  ;;  %s184_s0 = inlined_call_operand.hbm [shape: f32[2,3], index: 0, kind: input, shape index: {}]   ;;  %s185_s1 = inlined_call_operand.hbm [shape: f32[3,32], index: 1, kind: input, shape index: {}]   ;;  %s186_s2 = inlined_call_operand.hbm [shape: f32[3,32], index: 2, kind: input, shape index: {}]   ;;  %s187_s3 = inlined_call_operand.vmem [shape: f32[2,3,32], index: 3, kind: output, shape index: {}]  }
   0x1   :  { %9 = vsyncpa [#allocation5], 0  ;;  %s146_s12 = smov [#allocation4]   ;;  %s147_s14 = smov [#allocation2]  }
   0x2   :  { %s26_s13 = sshll.u32 %s146_s12, 4  ;;  %s16_s15 = sshll.u32 %s147_s14, 4  ;;  %s27_s13 = int_to_ptr.vmem [resolvable:$true] %s26_s13  ;;  %s17_s15 = int_to_ptr.vmem [resolvable:$true] %s16_s15 }
   0x3   :  { %s90_s16 = scalar_lea.vmem %s27_s13, 64  ;;  %p95_p1 = scmp.lt.s32.totalorder %s27_s13, %s27_s13 }
   0x4   :  { %p91_p0 = scmp.ne.s32.totalorder %s27_s13, %s90_s16  ;;  %p96_p2 = scmp.lt.s32.totalorder %s90_s16, %s90_s16 }
   0x6   :  { %p97_p3 = por %p96_p2, %p95_p1 }
   0x8   :  { %p98_p4 = pnand %p97_p3, %p91_p0 }
   0xa   :  { %101 = shalt.err (!%p98_p4)
}
   0xb   :  { %29 = dma.hbm_to_vmem [thread:$0]  %s185_s1, 64, %s27_s13, [#allocation5]  }
   0xc   :  { %s110_s19 = scalar_lea.vmem %s17_s15, 32  ;;  %p115_p6 = scmp.lt.s32.totalorder %s17_s15, %s17_s15 }
   0xd   :  { %p111_p5 = scmp.ne.s32.totalorder %s17_s15, %s110_s19  ;;  %p116_p7 = scmp.lt.s32.totalorder %s110_s19, %s110_s19 }
   0xf   :  { %p117_p8 = por %p116_p7, %p115_p6 }
  0x11   :  { %p118_p9 = pnand %p117_p8, %p111_p5 }
  0x13   :  { %121 = shalt.err (!%p118_p9)
}
  0x14   :  { %19 = dma.hbm_to_vmem [thread:$0]  %s184_s0, 32, %s17_s15, [#allocation3]  }
  0x15   :  { %s148_s22 = smov [#allocation6]  }
  0x16   :  { %s36_s23 = sshll.u32 %s148_s22, 4  ;;  %s37_s23 = int_to_ptr.vmem [resolvable:$true] %s36_s23 }
  0x17   :  { %s130_s24 = scalar_lea.vmem %s37_s23, 64  ;;  %p135_p11 = scmp.lt.s32.totalorder %s37_s23, %s37_s23 }
  0x18   :  { %p131_p10 = scmp.ne.s32.totalorder %s37_s23, %s130_s24  ;;  %p136_p12 = scmp.lt.s32.totalorder %s130_s24, %s130_s24 }
  0x1a   :  { %p137_p13 = por %p136_p12, %p135_p11 }
  0x1c   :  { %p138_p0 = pnand %p137_p13, %p131_p10 }
  0x1e   :  { %141 = shalt.err (!%p138_p0)
}
  0x1f   :  { %39 = dma.hbm_to_vmem [thread:$0]  %s186_s2, 64, %s37_s23, [#allocation5]  }
  0x20   :  { %142 = dma.done.wait [#allocation3], 32  }
  0x21   :  { %143 = vsyncadd [#allocation3], 4294967264 }
  0x22   :  { %144 = dma.done.wait [#allocation5], 128  }
  0x23   :  { %145 = vsyncadd [#allocation5], 4294967168  ;;  %v52_v0 = vlaneseq  ;;  %v49_v4 = vld [vmem:[#allocation2] sm:$0x3]  ;;  %v50_v7 = vld [vmem:[#allocation4] sm:$0x7] }
  0x24   :  { %v51_v8 = vld [vmem:[#allocation6] sm:$0x7]  ;;  %vm70_vm0 = vcmask 256000  }
  0x25   :  { %v53_v1 = vshrl.u32 %v52_v0, 7 }
  0x27   :  { %v54_v2 = vsub.s32 0, %v53_v1  ;;  %v61_v3 = vsub.s32 1, %v53_v1 }
  0x29   :  { %v55_v5 = vrot.slane %v49_v4, %v54_v2  ;;  %v62_v6 = vrot.slane %v49_v4, %v61_v3 }
  0x2b   :  { %57 = vbcast.lane.b32.xlu0 %v55_v5, 256 }
  0x2f   :  { %64 = vbcast.lane.b32.xlu0 %v62_v6, 256 }
  0x9d   :  { %v58_v9 = vpop.permute.xlu0 %57 }
  0x9e   :  { %v66_v10 = vmul.f32 %v58_v9, %v50_v7 }
  0xa0   :  { %v68_v11 = vadd.f32 %v66_v10, %v51_v8 }
  0xa1   :  { %v65_v12 = vpop.permute.xlu0 %64 }
  0xa2   :  { %71 = vst.msk [vmem:[%s187_s3] sm:$0x7] %vm70_vm0, %v68_v11  ;;  %v67_v13 = vmul.f32 %v65_v12, %v50_v7 }
  0xa4   :  { %v69_v14 = vadd.f32 %v67_v13, %v51_v8 }
  0xa6   :  { %72 = vst.msk [vmem:[%s187_s3 + $0x4] sm:$0x7] %vm70_vm0, %v69_v14 }
  0xa7   :  { %77 = vsyncpa [#allocation3], 1 }
  0xa8   :  { %78 = vsyncpa [#allocation5], 1 }

</bundles_post_ra>
